<compile_context>
chip_gen: v7x
topology: tpu7x:2x2x1
jax: 0.10.0
libtpu: 0.0.40
codegen_flags: <defaults>
</compile_context>

<pallas_src>
import math

import jax
import jax.numpy as jnp
from jax.experimental import pallas as pl
from jax.experimental.pallas import tpu as pltpu

_TWO_PI = 2.0 * math.pi

# Tiling policy: a few MiB of output per grid step; double-buffered working
# set kept under 16 MiB so it fits v7x's 32 MiB scoped VMEM with headroom
# (v5e/v6e have 128 MiB physical, so this is conservative there).
_VMEM_TILE_BUDGET = 16 * 1024 * 1024
_VMEM_LIMIT_BYTES = 32 * 1024 * 1024
_MAX_ROW_TILE = 8192
_MIN_ROW_TILE = 512
_SMALL_BATCH = 1024          # at/below this: single grid-free call


def _embed_kernel(t_ref, w_ref, o_ref):
    # t_ref: (TB, 1) f32   w_ref: (1, H) f32   o_ref: (TB, 1 + 2*H) f32
    t = t_ref[...]
    freqs = t * (w_ref[...] * _TWO_PI)      # VPU broadcast multiply; 2*pi folded into the (1,H) row
    # TODO(synk): on v7x (VALU-bound regime) share the sin/cos range reduction
    # and pack 128/(2H) batch rows per lane-row for narrow half_dim.
    o_ref[...] = jnp.concatenate([t, jnp.sin(freqs), jnp.cos(freqs)], axis=-1)


def _pick_row_tile(b: int, out_width: int) -> int:
    # Double-buffered f32 bytes per row: the output tile plus the (rows, 1)
    # time column, which is physically lane-padded to 128 lanes in VMEM.
    bytes_per_row = 2 * 4 * (out_width + 128)
    rows = _VMEM_TILE_BUDGET // bytes_per_row
    rows = max(_MIN_ROW_TILE, min(_MAX_ROW_TILE, rows))
    # Guarantee >= 2 grid steps so the parallel batch axis can shard across
    # both v7x TensorCores.
    two_step = -(-b // 2)
    two_step = -(-two_step // 8) * 8
    rows = min(rows, max(_MIN_ROW_TILE, two_step))
    return max(8, rows - rows % 8)


def stable_audio_positional_embedding(times: jax.Array, weights: jax.Array) -> jax.Array:
    """times: (...,), weights: (half_dim,) -> (..., 1 + 2*half_dim), float32.

    Matches the PyTorch module run in fp32 (all math is float32).
    """
    half = weights.shape[0]
    out_w = 1 + 2 * half
    lead_shape = times.shape
    b = math.prod(lead_shape)

    if b == 0:  # empty batch: nothing to compute
        return jnp.zeros((*lead_shape, out_w), jnp.float32)

    t_col = times.reshape(b, 1).astype(jnp.float32)        # (B, 1)
    w_row = weights.reshape(1, half).astype(jnp.float32)   # (1, H)

    if b <= _SMALL_BATCH:
        # Tiny problem: grid-free call, everything VMEM-resident.
        # (For sub-100 KiB outputs, letting XLA fuse the plain jnp expression
        # with neighbors is preferable; the Pallas path is kept here so the
        # kernel is always exercised.)
        out = pl.pallas_call(
            _embed_kernel,
            out_shape=jax.ShapeDtypeStruct((b, out_w), jnp.float32),
            in_specs=[
                pl.BlockSpec(memory_space=pltpu.MemorySpace.VMEM),
                pl.BlockSpec(memory_space=pltpu.MemorySpace.VMEM),
            ],
            out_specs=pl.BlockSpec(memory_space=pltpu.MemorySpace.VMEM),
        )(t_col, w_row)
    else:
        tb = _pick_row_tile(b, out_w)
        out = pl.pallas_call(
            _embed_kernel,
            out_shape=jax.ShapeDtypeStruct((b, out_w), jnp.float32),
            grid=(pl.cdiv(b, tb),),
            in_specs=[
                pl.BlockSpec((tb, 1), lambda i: (i, 0)),
                pl.BlockSpec((1, half), lambda i: (0, 0)),
            ],
            out_specs=pl.BlockSpec((tb, out_w), lambda i: (i, 0)),
            compiler_params=pltpu.CompilerParams(
                dimension_semantics=("parallel",),
                vmem_limit_bytes=_VMEM_LIMIT_BYTES),
        )(t_col, w_row)

    return out.reshape(*lead_shape, out_w)


def _reference(times, weights):
    t = times[..., None].astype(jnp.float32)
    freqs = t * weights.astype(jnp.float32) * _TWO_PI
    return jnp.concatenate([t, jnp.sin(freqs), jnp.cos(freqs)], axis=-1)


if __name__ == "__main__":
    key = jax.random.PRNGKey(0)
    k_t, k_w, k_t2 = jax.random.split(key, 3)

    dim = 32                 # embedding dim (even); half_dim = 16
    half_dim = dim // 2
    batch = 8

    weights = jax.random.normal(k_w, (half_dim,), dtype=jnp.float32)
    times = jax.random.uniform(k_t, (batch,), dtype=jnp.float32)

    # Small-batch (grid-free) path.
    out = jax.block_until_ready(stable_audio_positional_embedding(times, weights))
    ref = _reference(times, weights)
    assert out.shape == (batch, 1 + dim), out.shape
    assert jnp.allclose(out, ref, atol=1e-5, rtol=1e-5), "mismatch (small path)"

    # Gridded path with a ragged last block (no pad / no slice in the wrapper).
    big_batch = 2050
    big_times = jax.random.uniform(k_t2, (big_batch,), dtype=jnp.float32)
    big_out = jax.block_until_ready(
        stable_audio_positional_embedding(big_times, weights))
    big_ref = _reference(big_times, weights)
    assert big_out.shape == (big_batch, 1 + dim), big_out.shape
    assert jnp.allclose(big_out, big_ref, atol=1e-5, rtol=1e-5), "mismatch (gridded path)"

    # Scalar times (matches PyTorch broadcasting of times[..., None]).
    s_out = jax.block_until_ready(
        stable_audio_positional_embedding(jnp.float32(0.5), weights))
    s_ref = _reference(jnp.float32(0.5), weights)
    assert s_out.shape == (1 + dim,), s_out.shape
    assert jnp.allclose(s_out, s_ref, atol=1e-5, rtol=1e-5), "mismatch (scalar path)"

    print("KERNEL_OK")
</pallas_src>

<mosaic_0001>
module attributes {stable_mosaic.version = 11 : i64} {
  func.func @_embed_kernel(%arg0: memref<8x1xf32, #tpu.memory_space<vmem>>, %arg1: memref<1x16xf32, #tpu.memory_space<vmem>>, %arg2: memref<8x33xf32, #tpu.memory_space<vmem>>) attributes {dimension_semantics = [], scalar_prefetch = 0 : i64, scratch_operands = 0 : i64, tpu.core_type = #tpu.core_type<tc>} {
    %c0 = arith.constant 0 : index
    %c0_0 = arith.constant 0 : index
    %0 = vector.load %arg0[%c0, %c0_0] : memref<8x1xf32, #tpu.memory_space<vmem>>, vector<8x1xf32>
    %c0_1 = arith.constant 0 : index
    %c0_2 = arith.constant 0 : index
    %1 = vector.load %arg1[%c0_1, %c0_2] : memref<1x16xf32, #tpu.memory_space<vmem>>, vector<1x16xf32>
    %cst = arith.constant 6.28318548 : f32
    %2 = vector.broadcast %cst : f32 to vector<1x16xf32>
    %3 = arith.mulf %1, %2 : vector<1x16xf32>
    %4 = vector.broadcast %0 : vector<8x1xf32> to vector<8x16xf32>
    %5 = vector.broadcast %3 : vector<1x16xf32> to vector<8x16xf32>
    %6 = arith.mulf %4, %5 : vector<8x16xf32>
    %7 = math.sin %6 : vector<8x16xf32>
    %8 = math.cos %6 : vector<8x16xf32>
    %9 = tpu.concatenate %0, %7, %8 in 1 : vector<8x1xf32>, vector<8x16xf32>, vector<8x16xf32> -> vector<8x33xf32>
    %c0_3 = arith.constant 0 : index
    %c0_4 = arith.constant 0 : index
    %10 = vector.load %arg2[%c0_3, %c0_4] : memref<8x33xf32, #tpu.memory_space<vmem>>, vector<8x33xf32>
    tpu.vector_store %arg2[%c0_3, %c0_4], %9 {strides = array<i32>} : memref<8x33xf32, #tpu.memory_space<vmem>>, vector<8x33xf32>,
    return
  }
}

</mosaic_0001>

<bundles_post_ra>
// kernel: tpu_custom_call.1
= control target key start
LH: loop header
LB: loop body
LE: loop exit
PB: predicated region body
PF: predicated region fallthrough
CT: control target
= control target key end

     0   :  { %v313_v1 = vmov 0   ;;  %s381_s0 = inlined_call_operand.vmem [shape: f32[8,1], index: 0, kind: input, shape index: {}]   ;;  %s382_s1 = inlined_call_operand.vmem [shape: f32[1,16], index: 1, kind: input, shape index: {}]   ;;  %s383_s2 = inlined_call_operand.hbm [shape: f32[8,33], index: 2, kind: output, shape index: {}]  }
   0x1   :  { %v341_v0 = vld [vmem:[%s381_s0] sm:$0xff]  ;;  %284 = vset.pattern.permute.xlu0 %v313_v1 }
   0x2   :  { %17 = vperm.xlu0 %284, %v341_v0  }
   0x3   :  { %7 = vsyncpa [#allocation3], 0  ;;  %v21_v2 = vlaneseq  ;;  %v13_v4 = vld [vmem:[%s382_s1] sm:$0x1]  ;;  %v314_v21 = vmov 2102212464  }
   0x4   :  { %v14_v5 = vmul.f32 6.2831855, %v13_v4  ;;  %v315_v23 = vmov 920167782   ;;  %v316_v27 = vmov 1326507024  }
   0x5   :  { %v22_v3 = vshrl.u32 %v21_v2, 7  ;;  %v317_v29 = vmov 683565275   ;;  %v318_v31 = vmov 2475754826   ;;  %s320_s0 = smov 17  }
   0x6   :  { %v319_v34 = vmov 2131351028   ;;  %s321_s1 = smov 1   ;;  %s322_s13 = smov [#allocation2]  }
   0x7   :  { %v23_v6 = vsub.s32 0, %v22_v3  ;;  %s254_s14 = sshll.u32 %s322_s13, 4  ;;  %s255_s14 = int_to_ptr.vmem [resolvable:$true] %s254_s14 }
   0x8   :  { %s289_s15 = scalar_lea.vmem %s255_s14, 128  ;;  %p294_p1 = scmp.lt.s32.totalorder %s255_s14, %s255_s14 }
   0x9   :  { %v24_v7 = vrot.slane %v14_v5, %v23_v6  ;;  %p290_p0 = scmp.ne.s32.totalorder %s255_s14, %s289_s15  ;;  %p295_p2 = scmp.lt.s32.totalorder %s289_s15, %s289_s15 }
   0xb   :  { %p296_p3 = por %p295_p2, %p294_p1 }
   0xd   :  { %p297_p4 = pnand %p296_p3, %p290_p0 }
  0x81   :  { %v18_v8 = vpop.permute.xlu0 %17 }
  0x82   :  { %v347_v9 = vmul.f32 %v24_v7, %v18_v8 }
  0x84   :  { %v30_v10 = vand.u32 2139095040, %v347_v9  ;;  %v27_v11 = vand.u32 2147483647, %v347_v9  ;;  %vm29_vm7 = vcmp.lt.s32.totalorder %v347_v9, 0  ;;  %vm119_vm15 = vweird.f32 %v347_v9 }
  0x86   :  { %v31_v12 = vshrl.u32 %v30_v10, 23  ;;  %v34_v14 = vand.u32 8388607, %v27_v11  ;;  %vm28_vm8 = vcmp.le.f32.partialorder %v27_v11, 0.7853982 }
  0x88   :  { %v262_v13 = vadd.s32 4294967169, %v31_v12  ;;  %v35_v17 = vor.u32 8388608, %v34_v14 }
  0x8a   :  { %v37_v15 = vadd.s32 1, %v262_v13  ;;  %v75_v25 = vshll.u32 %v35_v17, 8 }
  0x8c   :  { %vm38_vm0 = vcmp.gt.s32.totalorder %v37_v15, 0 }
  0x8d   :  { %v39_v16 = vsel %vm38_vm0, %v37_v15, 0  ;;  %vm242_vm0 = vcmask 7168  }
  0x8e   :  { %v41_v18 = vand.u32 31, %v39_v16  ;;  %v40_v19 = vshrl.u32 %v39_v16, 5 }
  0x90   :  { %v42_v20 = vsub.s32 32, %v41_v18  ;;  %v53_v22 = vshll.u32 %v314_v21, %v41_v18  ;;  %v56_v24 = vshll.u32 %v315_v23, %v41_v18  ;;  %v44_v30 = vshll.u32 %v317_v29, %v41_v18 }
  0x91   :  { %v47_v33 = vshll.u32 %v318_v31, %v41_v18  ;;  %v50_v36 = vshll.u32 %v319_v34, %v41_v18  ;;  %vm62_vm1 = vcmp.lt.s32.totalorder %v40_v19, 4  ;;  %vm59_vm2 = vcmp.lt.s32.totalorder %v40_v19, 1 }
  0x92   :  { %v54_v26 = vshrl.u32 %v315_v23, %v42_v20  ;;  %v57_v28 = vshrl.u32 %v316_v27, %v42_v20  ;;  %v45_v32 = vshrl.u32 %v318_v31, %v42_v20  ;;  %v48_v35 = vshrl.u32 %v319_v34, %v42_v20 }
  0x93   :  { %v51_v37 = vshrl.u32 %v314_v21, %v42_v20  ;;  %v43_v41 = vshrl.u32 %v317_v29, %v42_v20  ;;  %vm60_vm3 = vcmp.lt.s32.totalorder %v40_v19, 2  ;;  %vm61_vm4 = vcmp.lt.s32.totalorder %v40_v19, 3 }
  0x94   :  { %v55_v38 = vor.u32 %v54_v26, %v53_v22  ;;  %v58_v39 = vor.u32 %v57_v28, %v56_v24  ;;  %v46_v40 = vor.u32 %v45_v32, %v44_v30  ;;  %v49_v42 = vor.u32 %v48_v35, %v47_v33 }
  0x95   :  { %v52_v43 = vor.u32 %v51_v37, %v50_v36 }
  0x96   :  { %v68_v44 = vsel %vm62_vm1, %v55_v38, 920167782  ;;  %v72_v45 = vsel %vm62_vm1, %v58_v39, 1326507024  ;;  %v67_v47 = vsel %vm59_vm2, %v46_v40, %v49_v42  ;;  %v63_v50 = vsel %vm59_vm2, %v43_v41, %v46_v40 }
  0x97   :  { %v64_v46 = vsel %vm62_vm1, %v52_v43, 2102212464  ;;  %v69_v48 = vsel %vm61_vm4, %v52_v43, %v68_v44  ;;  %v71_v49 = vsel %vm59_vm2, %v49_v42, %v52_v43  ;;  %v73_v53 = vsel %vm61_vm4, %v55_v38, %v72_v45 }
  0x98   :  { %v65_v51 = vsel %vm61_vm4, %v49_v42, %v64_v46  ;;  %v70_v52 = vsel %vm60_vm3, %v67_v47, %v69_v48  ;;  %v74_v54 = vsel %vm60_vm3, %v71_v49, %v73_v53  ;;  %vm244_vm1 = vcmask 138240  }
  0x99   :  { %v353_v55 = vmul.u32.u64.low %v75_v25, %v70_v52  ;;  %v354_v56 = vmul.u32.u64.high %v75_v25, %v70_v52, %v353_v55  ;;  %v356_v57 = vmul.u32.u64.low %v75_v25, %v74_v54  ;;  %v357_v58 = vmul.u32.u64.high %v75_v25, %v74_v54, %v356_v57 }
  0x9a   :  { %v66_v59 = vsel %vm60_vm3, %v63_v50, %v65_v51  ;;  %vm246_vm2 = vcmask 269312  }
  0x9b   :  { %v85_v60 = vadd.s32 1, %v354_v56  ;;  %v82_v61 = vmul.u32 %v75_v25, %v66_v59  ;;  %vm84_vm5 = vc.u32 %v357_v58, %v353_v55  ;;  %v83_v12 = vadd.s32 %v353_v55, %v357_v58 }
  0x9d   :  { %v86_v62 = vsel %vm84_vm5, %v85_v60, %v354_v56 }
  0x9e   :  { %v87_v63 = vadd.s32 %v86_v62, %v82_v61 }
  0xa0   :  { %v88_v1 = vadd.s32 536870912, %v87_v63 }
  0xa2   :  { %v89_v2 = vshrl.u32 %v88_v1, 30 }
  0xa4   :  { %v90_v3 = vshll.u32 %v89_v2, 30  ;;  %v113_v24 = vsub.s32 4, %v89_v2 }
  0xa6   :  { %v91_v4 = vsub.s32 %v87_v63, %v90_v3  ;;  %v114_v27 = vsel %vm29_vm7, %v113_v24, %v89_v2 }
  0xa7   :  { %v116_v29 = vsel %vm28_vm8, 0, %v114_v27 }
  0xa8   :  { %v93_v5 = vsub.s32 0, %v91_v4  ;;  %v120_v30 = vadd.s32 3, %v116_v29  ;;  %v224_v31 = vand.u32 3, %v116_v29 }
  0xaa   :  { %v263_v6 = vmin.u32 %v93_v5, %v91_v4  ;;  %v121_v32 = vand.u32 3, %v120_v30  ;;  %vm229_vm9 = vcmp.eq.s32.totalorder %v224_v31, 2  ;;  %vm226_vm11 = vcmp.eq.s32.totalorder %v224_v31, 0 }
  0xab   :  { %vm225_vm13 = vcmp.lt.s32.totalorder %v224_v31, 2 }
  0xac   :  { %v95_v7 = vclz %v263_v6  ;;  %vm126_vm10 = vcmp.eq.s32.totalorder %v121_v32, 2  ;;  %vm123_vm12 = vcmp.eq.s32.totalorder %v121_v32, 0  ;;  %vm122_vm14 = vcmp.lt.s32.totalorder %v121_v32, 2 }
  0xae   :  { %v264_v8 = vadd.s32 4294967294, %v95_v7 }
  0xb0   :  { %vm265_vm6 = vcmp.lt.s32.totalorder %v264_v8, 0 }
  0xb1   :  { %v98_v10 = vsel %vm265_vm6, 0, %v264_v8 }
  0xb2   :  { %v99_v13 = vsub.s32 32, %v98_v10  ;;  %v103_v14 = vsub.s32 4294967266, %v98_v10  ;;  %v100_v15 = vshll.u32 %v91_v4, %v98_v10 }
  0xb4   :  { %v101_v16 = vshrl.u32 %v83_v12, %v99_v13  ;;  %v104_v17 = vadd.s32 127, %v103_v14 }
  0xb6   :  { %v102_v18 = vor.u32 %v101_v16, %v100_v15  ;;  %v105_v19 = vshll.u32 %v104_v17, 23 }
  0xb8   :  { %v106_v20 = vor.u32 4788187, %v105_v19  ;;  %v109_v22 = vcvt.s32.f32 %v102_v18 }
  0xba   :  { %v107_v21 = vand.u32 2147483647, %v106_v20 }
  0xbc   :  { %v110_v23 = vmul.f32 %v109_v22, %v107_v21 }
  0xbe   :  { %v111_v25 = vxor.u32 2147483648, %v110_v23 }
  0xc0   :  { %v112_v26 = vsel %vm29_vm7, %v111_v25, %v110_v23 }
  0xc1   :  { %v115_v28 = vsel %vm28_vm8, %v347_v9, %v112_v26 }
  0xc2   :  { %285 = vcosq.f32 %v115_v28 }
  0xc3   :  { %287 = vsinq.f32 %v115_v28 }
  0xcc   :  { %v286_v33 = vpop.eup %285 }
  0xcd   :  { %v288_v34 = vpop.eup %287  ;;  %v127_v35 = vxor.u32 2147483648, %v286_v33 }
  0xce   :  { %v124_v36 = vxor.u32 2147483648, %v288_v34 }
  0xcf   :  { %v231_v37 = vsel %vm229_vm9, %v127_v35, %v288_v34  ;;  %v128_v11 = vsel %vm126_vm10, %v127_v35, %v288_v34 }
  0xd0   :  { %v228_v38 = vsel %vm226_vm11, %v286_v33, %v124_v36  ;;  %v125_v39 = vsel %vm123_vm12, %v286_v33, %v124_v36 }
  0xd1   :  { %v232_v40 = vsel %vm225_vm13, %v228_v38, %v231_v37  ;;  %v129_v41 = vsel %vm122_vm14, %v125_v39, %v128_v11 }
  0xd2   :  { %v233_v42 = vsel %vm119_vm15, nan, %v232_v40  ;;  %v130_v43 = vsel %vm119_vm15, nan, %v129_v41 }
  0xd3   :  { %239 = vrot.lane.b32.xlu1 %v233_v42, %s320_s0  ;;  %235 = vrot.lane.b32.xlu0 %v130_v43, %s321_s1 }
 0x145   :  { %v240_v44 = vpop.permute.xlu1 %239  ;;  %v236_v45 = vpop.permute.xlu0 %235 }
 0x146   :  { %v243_v46 = vsel %vm242_vm0, %v341_v0, %v236_v45 }
 0x147   :  { %v245_v47 = vsel %vm244_vm1, %v243_v46, %v240_v44 }
 0x148   :  { %247 = vst.msk [vmem:[#allocation2] sm:$0xff] %vm246_vm2, %v245_v47 }
 0x149   :  { %300 = shalt.err (!%p297_p4)
}
 0x14a   :  { %s301_s18 = scalar_lea.hbm %s383_s2, 128 }
 0x14b   :  { %p302_p5 = scmp.ne.s32.totalorder %s383_s2, %s301_s18  ;;  %p305_p6 = scmp.lt.u32.totalorder %s301_s18, %s383_s2 }
 0x14d   :  { %p307_p7 = pnand %p305_p6, %p302_p5 }
 0x14f   :  { %310 = shalt.err (!%p307_p7)
}
 0x150   :  { %257 = dma.vmem_to_hbm [thread:$0]  %s255_s14, 128, %s383_s2, [#allocation3]  }
 0x151   :  { %311 = dma.done.wait [#allocation3], 128  }
 0x152   :  { %312 = vsyncadd [#allocation3], 4294967168 }
 0x153   :  { %261 = vsyncpa [#allocation3], 1 }

</bundles_post_ra>
